<compile_context>
chip_gen: v7x
topology: tpu7x:2x2x1
jax: 0.10.0
libtpu: 0.0.40
codegen_flags: <defaults>
</compile_context>

<pallas_src>
import jax
import jax.numpy as jnp
from jax.experimental import pallas as pl
from jax.experimental.pallas import tpu as pltpu

LANE = 128                       # channel dims padded to the 128-wide lane axis
ROW_ALIGN = 256                  # node-dim alignment (fills 256x256 MXU on v6e/v7x)
TILE_CANDIDATES = (1024, 768, 512, 256)   # largest divisor of n_pad wins
VMEM_LIMIT = 32 * 1024 * 1024    # well under v7x's 64 MiB physical VMEM


def _round_up(x, m):
    return (x + m - 1) // m * m


def _pad2d(x, rows, cols):
    r, c = x.shape
    return jnp.pad(x, ((0, rows - r), (0, cols - c)))


def _node_padding(n):
    """256-aligned node count and the largest tile (<=1024) that divides it."""
    n_pad = _round_up(max(n, ROW_ALIGN), ROW_ALIGN)
    tile = ROW_ALIGN
    for t in TILE_CANDIDATES:
        if t <= n_pad and n_pad % t == 0:
            tile = t
            break
    return n_pad, tile


# ---------------------------------------------------------------------------
# Pallas kernels
# ---------------------------------------------------------------------------
def transform_kernel(h_ref, w_ref, o_ref):
    """XW = H @ W for one row tile (bf16 MXU, f32 accumulate, bf16 store)."""
    o_ref[...] = jnp.dot(
        h_ref[...], w_ref[...], preferred_element_type=jnp.float32
    ).astype(o_ref.dtype)


def aggregate_kernel(a_ref, xw_ref, b_ref, o_ref, acc_ref):
    """One (row-tile i, col-tile k) step of  relu(A_hat @ XW + b)."""
    k = pl.program_id(1)

    @pl.when(k == 0)
    def _():
        acc_ref[...] = jnp.zeros_like(acc_ref)

    acc_ref[...] += jnp.dot(a_ref[...], xw_ref[...],
                            preferred_element_type=jnp.float32)

    @pl.when(k == pl.num_programs(1) - 1)
    def _():
        # TODO(synk): F.dropout(p=0.5) is identity in eval mode; training-mode masking omitted.
        o_ref[...] = jnp.maximum(acc_ref[...] + b_ref[...], 0.0).astype(o_ref.dtype)


def linear_kernel(x_ref, w_ref, b_ref, o_ref):
    o_ref[...] = (
        jnp.dot(x_ref[...], w_ref[...], preferred_element_type=jnp.float32)
        + b_ref[...]
    ).astype(o_ref.dtype)


# ---------------------------------------------------------------------------
# Wrappers (all inputs arrive pre-padded: N % tile == 0, channels % 128 == 0)
# ---------------------------------------------------------------------------
def feature_transform(h, w, tile):
    n, c_in = h.shape
    c_out = w.shape[1]
    grid = (n // tile,)

    flops = 2 * n * c_in * c_out
    bytes_accessed = (h.size * h.dtype.itemsize
                      + (n // tile) * w.size * w.dtype.itemsize
                      + n * c_out * 2)

    return pl.pallas_call(
        transform_kernel,
        out_shape=jax.ShapeDtypeStruct((n, c_out), jnp.bfloat16),
        grid_spec=pltpu.PrefetchScalarGridSpec(
            num_scalar_prefetch=0,
            grid=grid,
            in_specs=[
                pl.BlockSpec((tile, c_in), lambda i: (i, 0)),     # H row tile
                pl.BlockSpec((c_in, c_out), lambda i: (0, 0)),    # W (whole)
            ],
            out_specs=pl.BlockSpec((tile, c_out), lambda i: (i, 0)),
        ),
        compiler_params=pltpu.CompilerParams(
            dimension_semantics=("parallel",),
            vmem_limit_bytes=VMEM_LIMIT,
        ),
        cost_estimate=pl.CostEstimate(
            flops=flops, transcendentals=0, bytes_accessed=bytes_accessed),
    )(h, w)


def aggregate(a_hat, xw, b, tile):
    n = a_hat.shape[0]
    c_out = xw.shape[1]
    grid = (n // tile, n // tile)

    flops = 2 * n * n * c_out
    bytes_accessed = (a_hat.size * a_hat.dtype.itemsize
                      + (n // tile) * xw.size * xw.dtype.itemsize
                      + b.size * b.dtype.itemsize
                      + n * c_out * 2)

    return pl.pallas_call(
        aggregate_kernel,
        out_shape=jax.ShapeDtypeStruct((n, c_out), jnp.bfloat16),
        grid_spec=pltpu.PrefetchScalarGridSpec(
            num_scalar_prefetch=0,
            grid=grid,
            in_specs=[
                pl.BlockSpec((tile, tile), lambda i, k: (i, k)),    # A_hat tile
                pl.BlockSpec((tile, c_out), lambda i, k: (k, 0)),   # XW rows for this k
                pl.BlockSpec((1, c_out), lambda i, k: (0, 0)),      # bias (whole)
            ],
            out_specs=pl.BlockSpec((tile, c_out), lambda i, k: (i, 0)),
            scratch_shapes=[pltpu.VMEM((tile, c_out), jnp.float32)],
        ),
        compiler_params=pltpu.CompilerParams(
            dimension_semantics=("parallel", "arbitrary"),
            vmem_limit_bytes=VMEM_LIMIT,
        ),
        cost_estimate=pl.CostEstimate(
            flops=flops, transcendentals=0, bytes_accessed=bytes_accessed),
    )(a_hat, xw, b)


def linear(x, w, b, tile, out_dtype=jnp.float32):
    n, k = x.shape
    c_out = w.shape[1]
    grid = (n // tile,)

    flops = 2 * n * k * c_out
    bytes_accessed = (x.size * x.dtype.itemsize
                      + (n // tile) * w.size * w.dtype.itemsize
                      + b.size * b.dtype.itemsize + n * c_out * 4)

    return pl.pallas_call(
        linear_kernel,
        out_shape=jax.ShapeDtypeStruct((n, c_out), out_dtype),
        grid_spec=pltpu.PrefetchScalarGridSpec(
            num_scalar_prefetch=0,
            grid=grid,
            in_specs=[
                pl.BlockSpec((tile, k), lambda i: (i, 0)),
                pl.BlockSpec((k, c_out), lambda i: (0, 0)),
                pl.BlockSpec((1, c_out), lambda i: (0, 0)),
            ],
            out_specs=pl.BlockSpec((tile, c_out), lambda i: (i, 0)),
        ),
        compiler_params=pltpu.CompilerParams(
            dimension_semantics=("parallel",),
            vmem_limit_bytes=VMEM_LIMIT,
        ),
        cost_estimate=pl.CostEstimate(
            flops=flops, transcendentals=0, bytes_accessed=bytes_accessed),
    )(x, w, b)


# ---------------------------------------------------------------------------
# Glue: normalized adjacency (PyG GCNConv default: add_remaining_self_loops + sym norm)
# ---------------------------------------------------------------------------
def build_normalized_adjacency(edge_index, num_nodes, num_nodes_pad):
    src = edge_index[0]
    dst = edge_index[1]
    a = jnp.zeros((num_nodes, num_nodes), jnp.float32).at[dst, src].add(1.0)
    # add a self loop only to nodes that do not already have one (no double counting)
    diag = jnp.diagonal(a)
    idx = jnp.arange(num_nodes)
    a = a.at[idx, idx].set(jnp.where(diag > 0, diag, 1.0))
    deg = a.sum(axis=1)
    d_inv_sqrt = jnp.where(deg > 0, 1.0 / jnp.sqrt(deg), 0.0)
    a = d_inv_sqrt[:, None] * a * d_inv_sqrt[None, :]
    # zero-pad to the tiled node count: padded rows/cols stay zero so padded nodes
    # never contaminate real nodes' aggregation.
    a = jnp.pad(a, ((0, num_nodes_pad - num_nodes), (0, num_nodes_pad - num_nodes)))
    return a.astype(jnp.bfloat16)


# ---------------------------------------------------------------------------
# Parameter init (deterministic, Glorot-style conv weights, zero conv bias,
# PyTorch-Linear-style uniform for the final layer) — stored pre-padded to 128 lanes.
# ---------------------------------------------------------------------------
def init_params(key, starting_features, hidden_channels, output_features):
    dims = [starting_features] + list(hidden_channels)
    convs = []
    for c_in, c_out in zip(dims[:-1], dims[1:]):
        key, k_w = jax.random.split(key)
        scale = (6.0 / (c_in + c_out)) ** 0.5
        w = jax.random.uniform(k_w, (c_in, c_out), jnp.float32, -scale, scale)
        b = jnp.zeros((1, c_out), jnp.float32)
        c_in_p, c_out_p = _round_up(c_in, LANE), _round_up(c_out, LANE)
        convs.append((_pad2d(w, c_in_p, c_out_p).astype(jnp.bfloat16),
                      _pad2d(b, 1, c_out_p)))

    # Final linear over concat([x, h_1, ..., h_L]); every segment is padded to a
    # multiple of 128 lanes, so scatter the real weight rows into a zero-padded slab.
    total = starting_features + sum(hidden_channels)
    key, k_lw, k_lb = jax.random.split(key, 3)
    scale = (1.0 / total) ** 0.5
    lin_w = jax.random.uniform(k_lw, (total, output_features), jnp.float32, -scale, scale)
    lin_b = jax.random.uniform(k_lb, (1, output_features), jnp.float32, -scale, scale)

    out_p = _round_up(output_features, LANE)
    seg_sizes = dims
    seg_sizes_p = [_round_up(s, LANE) for s in seg_sizes]
    lin_w_p = jnp.zeros((sum(seg_sizes_p), out_p), jnp.float32)
    row_real, row_pad = 0, 0
    for s_real, s_pad in zip(seg_sizes, seg_sizes_p):
        lin_w_p = lin_w_p.at[row_pad:row_pad + s_real, :output_features].set(
            lin_w[row_real:row_real + s_real])
        row_real += s_real
        row_pad += s_pad
    lin_b_p = _pad2d(lin_b, 1, out_p)

    return {
        "convs": convs,
        "lin_w": lin_w_p.astype(jnp.bfloat16),
        "lin_b": lin_b_p,
        "output_features": output_features,
    }


# ---------------------------------------------------------------------------
# Forward pass (agg_method == 'concat')
# ---------------------------------------------------------------------------
def gcn_jk_concat_forward(params, x, edge_index):
    n, c0 = x.shape
    n_pad, tile = _node_padding(n)
    a_hat = build_normalized_adjacency(edge_index, n, n_pad)

    h = _pad2d(x, n_pad, _round_up(c0, LANE)).astype(jnp.bfloat16)

    layer_outputs = [h]                         # jumping knowledge: include the (padded) input
    for w, b in params["convs"]:
        xw = feature_transform(h, w, tile)      # H @ W   (computed once per layer)
        h = aggregate(a_hat, xw, b, tile)       # relu(A_hat @ XW + b), dropout = identity (eval)
        layer_outputs.append(h)

    # every segment is lane-dense (128-multiple channels) with zero-filled padding
    agg = jnp.concatenate(layer_outputs, axis=1)
    out = linear(agg, params["lin_w"], params["lin_b"], tile, out_dtype=jnp.float32)
    return out[:n, :params["output_features"]]


# ---------------------------------------------------------------------------
if __name__ == "__main__":
    starting_features = 16
    hidden_channels = [32, 32]
    output_features = 8
    num_nodes = 64
    num_edges = 128

    key = jax.random.PRNGKey(0)
    k_x, k_src, k_dst, k_params = jax.random.split(key, 4)

    x = jax.random.normal(k_x, (num_nodes, starting_features), jnp.float32)
    edge_index = jnp.stack(
        [
            jax.random.randint(k_src, (num_edges,), 0, num_nodes),
            jax.random.randint(k_dst, (num_edges,), 0, num_nodes),
        ],
        axis=0,
    ).astype(jnp.int32)

    params = init_params(
        k_params, starting_features, hidden_channels, output_features
    )

    out = gcn_jk_concat_forward(params, x, edge_index)
    out = jax.block_until_ready(out)
    assert out.shape == (num_nodes, output_features)
    assert bool(jnp.all(jnp.isfinite(out)))
    print("KERNEL_OK")
</pallas_src>

<mosaic_0001>
module attributes {stable_mosaic.version = 11 : i64} {
  func.func @transform_kernel(%arg0: i32, %arg1: memref<256x128xbf16, #tpu.memory_space<vmem>>, %arg2: memref<128x128xbf16, #tpu.memory_space<vmem>>, %arg3: memref<256x128xbf16, #tpu.memory_space<vmem>>) attributes {dimension_semantics = [#tpu.dimension_semantics<parallel>], iteration_bounds = array<i64: 1>, scalar_prefetch = 0 : i64, scratch_operands = 0 : i64, tpu.core_type = #tpu.core_type<tc>, window_params = [{transform_indices = @transform_0, window_bounds = array<i64: 256, 128>}, {pipeline_mode = #tpu.pipeline_mode<synchronous>, transform_indices = @transform_1, window_bounds = array<i64: 128, 128>}, {transform_indices = @transform_2, window_bounds = array<i64: 256, 128>}]} {
    %c0 = arith.constant 0 : index
    %c0_0 = arith.constant 0 : index
    %0 = vector.load %arg1[%c0, %c0_0] : memref<256x128xbf16, #tpu.memory_space<vmem>>, vector<256x128xbf16>
    %c0_1 = arith.constant 0 : index
    %c0_2 = arith.constant 0 : index
    %1 = vector.load %arg2[%c0_1, %c0_2] : memref<128x128xbf16, #tpu.memory_space<vmem>>, vector<128x128xbf16>
    %cst = arith.constant dense<0.000000e+00> : vector<256x128xf32>
    %2 = tpu.matmul %0, %1, %cst {dimension_numbers = #tpu.dot_dimension_numbers<[1], [0], [0], [1], [0, 0, 1, 1], [], []>} : vector<256x128xbf16>, vector<128x128xbf16>, vector<256x128xf32> -> vector<256x128xf32>
    %3 = arith.truncf %2 : vector<256x128xf32> to vector<256x128xbf16>
    %c0_3 = arith.constant 0 : index
    %c0_4 = arith.constant 0 : index
    %4 = vector.load %arg3[%c0_3, %c0_4] : memref<256x128xbf16, #tpu.memory_space<vmem>>, vector<256x128xbf16>
    tpu.vector_store %arg3[%c0_3, %c0_4], %3 {strides = array<i32>} : memref<256x128xbf16, #tpu.memory_space<vmem>>, vector<256x128xbf16>,
    return
  }
  func.func @transform_0(%arg0: i32) -> (i32, i32) {
    %c0_i32 = arith.constant 0 : i32
    %c0_i32_0 = arith.constant 0 : i32
    return %arg0, %c0_i32 : i32, i32
  }
  func.func @transform_1(%arg0: i32) -> (i32, i32) {
    %c0_i32 = arith.constant 0 : i32
    %c0_i32_0 = arith.constant 0 : i32
    %c0_i32_1 = arith.constant 0 : i32
    return %c0_i32, %c0_i32_0 : i32, i32
  }
  func.func @transform_2(%arg0: i32) -> (i32, i32) {
    %c0_i32 = arith.constant 0 : i32
    %c0_i32_0 = arith.constant 0 : i32
    return %arg0, %c0_i32 : i32, i32
  }
}

</mosaic_0001>

<bundles_post_ra>
// kernel: tpu_custom_call.1
= control target key start
LH: loop header
LB: loop body
LE: loop exit
PB: predicated region body
PF: predicated region fallthrough
CT: control target
= control target key end

     0   :  { %7 = vsyncpa [#allocation3], 0  ;;  %s1009_s0 = inlined_call_operand.hbm [shape: bf16[256,128], index: 0, kind: input, shape index: {}]   ;;  %s1010_s1 = inlined_call_operand.hbm [shape: bf16[128,128], index: 1, kind: input, shape index: {}]   ;;  %s1011_s2 = inlined_call_operand.hbm [shape: bf16[256,128], index: 2, kind: output, shape index: {}]  }
   0x1   :  { %8 = vsyncpa [#allocation6], 0 }
   0x2   :  { %9 = vsyncpa [#allocation4], 0  ;;  %s944_s9 = smov [#allocation2]   ;;  %s872_s13 = scalar_lea.hbm %s1009_s0, 2048 }
   0x3   :  { %s15_s10 = sshll.u32 %s944_s9, 4  ;;  %p873_p0 = scmp.ne.s32.totalorder %s1009_s0, %s872_s13  ;;  %s16_s10 = int_to_ptr.vmem [resolvable:$true] %s15_s10 }
   0x4   :  { %p876_p1 = scmp.lt.u32.totalorder %s872_s13, %s1009_s0 }
   0x6   :  { %p878_p2 = pnand %p876_p1, %p873_p0 }
   0x8   :  { %881 = shalt.err (!%p878_p2)
}
   0x9   :  { %s882_s18 = scalar_lea.vmem %s16_s10, 2048  ;;  %p887_p4 = scmp.lt.s32.totalorder %s16_s10, %s16_s10 }
   0xa   :  { %p883_p3 = scmp.ne.s32.totalorder %s16_s10, %s882_s18  ;;  %p888_p5 = scmp.lt.s32.totalorder %s882_s18, %s882_s18 }
   0xc   :  { %p889_p6 = por %p888_p5, %p887_p4 }
   0xe   :  { %p890_p7 = pnand %p889_p6, %p883_p3 }
  0x10   :  { %893 = shalt.err (!%p890_p7)
}
  0x11   :  { %s945_s19 = smov 64   ;;  %s946_s20 = smov 4  }
  0x12   :  { %21 = dma.hbm_to_vmem [thread:$0]  %s1009_s0, 2048, %s16_s10, [#allocation3], %s945_s19, %s945_s19, %s946_s20  }
  0x13   :  { %s947_s23 = smov [#allocation5]   ;;  %s894_s27 = scalar_lea.hbm %s1010_s1, 1024 }
  0x14   :  { %s27_s24 = sshll.u32 %s947_s23, 4  ;;  %p895_p8 = scmp.ne.s32.totalorder %s1010_s1, %s894_s27  ;;  %s28_s24 = int_to_ptr.vmem [resolvable:$true] %s27_s24 }
  0x15   :  { %p898_p9 = scmp.lt.u32.totalorder %s894_s27, %s1010_s1 }
  0x17   :  { %p900_p10 = pnand %p898_p9, %p895_p8 }
  0x19   :  { %903 = shalt.err (!%p900_p10)
}
  0x1a   :  { %s904_s4 = scalar_lea.vmem %s28_s24, 1024  ;;  %p909_p12 = scmp.lt.s32.totalorder %s28_s24, %s28_s24 }
  0x1b   :  { %p905_p11 = scmp.ne.s32.totalorder %s28_s24, %s904_s4  ;;  %p910_p13 = scmp.lt.s32.totalorder %s904_s4, %s904_s4 }
  0x1d   :  { %p911_p0 = por %p910_p13, %p909_p12 }
  0x1f   :  { %p912_p1 = pnand %p911_p0, %p905_p11 }
  0x21   :  { %915 = shalt.err (!%p912_p1)
}
  0x22   :  { %33 = dma.hbm_to_vmem [thread:$0]  %s1010_s1, 1024, %s28_s24, [#allocation6], %s945_s19, %s945_s19, %s946_s20  }
  0x23   :  { %938 = dma.done.wait [#allocation3], 2048  }
  0x24   :  { %939 = vsyncadd [#allocation3], 4294965248 }
  0x25   :  { %940 = dma.done.wait [#allocation6], 1024  }
  0x26   :  { %941 = vsyncadd [#allocation6], 4294966272  ;;  %v848_v0 = vld [vmem:[#allocation5] sm:$0xff]   ;;  %v849_v1 = vld [vmem:[#allocation5 + $0x8] sm:$0xff]   ;;  %s948_s1 = smov [#allocation7]  }
  0x27   :  { %779 = vmatprep.subr.bf16.mxu0 %v848_v0  ;;  %827 = vmatprep.subr.bf16.mxu1 %v848_v0  ;;  %v850_v2 = vld [vmem:[#allocation5 + $0x10] sm:$0xff]   ;;  %v851_v3 = vld [vmem:[#allocation5 + $0x18] sm:$0xff]   ;;  %v856_v4 = vld [vmem:[#allocation2] sm:$0xff]   ;;  %s559_s6 = sshll.u32 %s948_s1, 4  ;;  %s560_s6 = int_to_ptr.vmem [resolvable:$true] %s559_s6 }
  0x28   :  { %780 = vmatpush3.bf16.msra.mxu0 %v848_v0  ;;  %835 = vmatpush3.bf16.msra.mxu1 %v848_v0  ;;  %v857_v5 = vld [vmem:[#allocation2 + $0x40] sm:$0xff]   ;;  %v853_v7 = vld [vmem:[#allocation5 + $0x28] sm:$0xff]   ;;  %v854_v8 = vld [vmem:[#allocation5 + $0x30] sm:$0xff]   ;;  %s916_s7 = scalar_lea.vmem %s560_s6, 2048  ;;  %p921_p3 = scmp.lt.s32.totalorder %s560_s6, %s560_s6 }
  0x29   :  { %781 = vmatprep.subr.bf16.mxu0 %v849_v1  ;;  %828 = vmatprep.subr.bf16.mxu1 %v849_v1  ;;  %v852_v6 = vld [vmem:[#allocation5 + $0x20] sm:$0xff]   ;;  %v855_v9 = vld [vmem:[#allocation5 + $0x38] sm:$0xff]   ;;  %v858_v10 = vld [vmem:[#allocation2 + $0x8] sm:$0xff]   ;;  %p917_p2 = scmp.ne.s32.totalorder %s560_s6, %s916_s7  ;;  %p922_p4 = scmp.lt.s32.totalorder %s916_s7, %s916_s7 }
  0x2a   :  { %795 = vmatprep.mubr.bf16.mxu0 %v856_v4  ;;  %811 = vmatprep.mubr.bf16.mxu1 %v857_v5  ;;  %v859_v11 = vld [vmem:[#allocation2 + $0x48] sm:$0xff]   ;;  %v860_v12 = vld [vmem:[#allocation2 + $0x10] sm:$0xff]   ;;  %v862_v14 = vld [vmem:[#allocation2 + $0x18] sm:$0xff]  }
  0x2b   :  { %v861_v13 = vld [vmem:[#allocation2 + $0x50] sm:$0xff]   ;;  %v863_v15 = vld [vmem:[#allocation2 + $0x58] sm:$0xff]   ;;  %v864_v16 = vld [vmem:[#allocation2 + $0x20] sm:$0xff]   ;;  %p923_p5 = por %p922_p4, %p921_p3 }
  0x2c   :  { %782 = vmatpush3.bf16.msra.mxu0 %v849_v1  ;;  %836 = vmatpush3.bf16.msra.mxu1 %v849_v1  ;;  %v865_v17 = vld [vmem:[#allocation2 + $0x60] sm:$0xff]   ;;  %v866_v18 = vld [vmem:[#allocation2 + $0x28] sm:$0xff]   ;;  %v868_v20 = vld [vmem:[#allocation2 + $0x30] sm:$0xff]  }
  0x2d   :  { %783 = vmatprep.subr.bf16.mxu0 %v850_v2  ;;  %829 = vmatprep.subr.bf16.mxu1 %v850_v2  ;;  %v867_v19 = vld [vmem:[#allocation2 + $0x68] sm:$0xff]   ;;  %v869_v21 = vld [vmem:[#allocation2 + $0x70] sm:$0xff]   ;;  %v870_v22 = vld [vmem:[#allocation2 + $0x38] sm:$0xff]   ;;  %p924_p6 = pnand %p923_p5, %p917_p2 }
  0x2e   :  { %v871_v23 = vld [vmem:[#allocation2 + $0x78] sm:$0xff]  }
  0x30   :  { %784 = vmatpush3.bf16.msra.mxu0 %v850_v2  ;;  %837 = vmatpush3.bf16.msra.mxu1 %v850_v2 }
  0x31   :  { %785 = vmatprep.subr.bf16.mxu0 %v851_v3  ;;  %830 = vmatprep.subr.bf16.mxu1 %v851_v3 }
  0x34   :  { %786 = vmatpush3.bf16.msra.mxu0 %v851_v3  ;;  %838 = vmatpush3.bf16.msra.mxu1 %v851_v3 }
  0x35   :  { %787 = vmatprep.subr.bf16.mxu0 %v852_v6  ;;  %831 = vmatprep.subr.bf16.mxu1 %v852_v6 }
  0x38   :  { %788 = vmatpush3.bf16.msra.mxu0 %v852_v6  ;;  %839 = vmatpush3.bf16.msra.mxu1 %v852_v6 }
  0x39   :  { %789 = vmatprep.subr.bf16.mxu0 %v853_v7  ;;  %832 = vmatprep.subr.bf16.mxu1 %v853_v7 }
  0x3c   :  { %790 = vmatpush3.bf16.msra.mxu0 %v853_v7  ;;  %840 = vmatpush3.bf16.msra.mxu1 %v853_v7 }
  0x3d   :  { %791 = vmatprep.subr.bf16.mxu0 %v854_v8  ;;  %833 = vmatprep.subr.bf16.mxu1 %v854_v8 }
  0x40   :  { %792 = vmatpush3.bf16.msra.mxu0 %v854_v8  ;;  %841 = vmatpush3.bf16.msra.mxu1 %v854_v8 }
  0x41   :  { %793 = vmatprep.subr.bf16.mxu0 %v855_v9  ;;  %834 = vmatprep.subr.bf16.mxu1 %v855_v9 }
  0x44   :  { %794 = vmatpush3.bf16.msra.mxu0 %v855_v9  ;;  %842 = vmatpush3.bf16.msra.mxu1 %v855_v9 }
  0x47   :  { %796 = vmatmul.mubr.bf16.vlgmr.msra.gmra.mrb[0].mxu0 %v858_v10  ;;  %812 = vmatmul.mubr.bf16.vlgmr.msra.gmra.mrb[0].mxu1 %v859_v11 }
  0x48   :  { %799 = vmatprep.mubr.bf16.mxu0 %v860_v12  ;;  %815 = vmatprep.mubr.bf16.mxu1 %v861_v13 }
  0x4f   :  { %800 = vmatmul.mubr.bf16.gmra.mrb[4].mxu0 %v862_v14  ;;  %816 = vmatmul.mubr.bf16.gmra.mrb[4].mxu1 %v863_v15 }
  0x50   :  { %803 = vmatprep.mubr.bf16.mxu0 %v864_v16  ;;  %819 = vmatprep.mubr.bf16.mxu1 %v865_v17 }
  0x57   :  { %804 = vmatmul.mubr.bf16.gmra.mrb[8].mxu0 %v866_v18  ;;  %820 = vmatmul.mubr.bf16.gmra.mrb[8].mxu1 %v867_v19 }
  0x58   :  { %807 = vmatprep.mubr.bf16.mxu0 %v868_v20  ;;  %823 = vmatprep.mubr.bf16.mxu1 %v869_v21 }
  0x5f   :  { %808 = vmatmul.mubr.bf16.gmra.mrb[12].mxu0 %v870_v22  ;;  %824 = vmatmul.mubr.bf16.gmra.mrb[12].mxu1 %v871_v23 }
 0x11a   :  { %v797_v24 = vpop.f32.mrb[0].mxu0  ;;  %v813_v25 = vpop.f32.mrb[0].mxu1 }
 0x11b   :  { %v267_v26 = vpop.f32.mrb[1].mxu0  ;;  %v331_v27 = vpop.f32.mrb[1].mxu1 }
 0x11c   :  { %v798_v28 = vpop.f32.mrb[2].mxu0  ;;  %v814_v29 = vpop.f32.mrb[2].mxu1 }
 0x11d   :  { %v668_v30 = vpack.c.bf16 %v798_v28, %v797_v24  ;;  %v708_v31 = vpack.c.bf16 %v814_v29, %v813_v25  ;;  %v270_v32 = vpop.f32.mrb[3].mxu0  ;;  %v334_v33 = vpop.f32.mrb[3].mxu1 }
 0x11e   :  { %v663_v34 = vpack.c.bf16 %v270_v32, %v267_v26  ;;  %v703_v35 = vpack.c.bf16 %v334_v33, %v331_v27 }
 0x11f   :  { %740 = vst [vmem:[#allocation7 + $0x8] sm:$0xff] %v668_v30   ;;  %748 = vst [vmem:[#allocation7 + $0x48] sm:$0xff] %v708_v31  }
 0x120   :  { %664 = vst [vmem:[#allocation7] sm:$0xff] %v663_v34   ;;  %747 = vst [vmem:[#allocation7 + $0x40] sm:$0xff] %v703_v35  }
 0x122   :  { %v801_v36 = vpop.f32.mrb[4].mxu0  ;;  %v817_v37 = vpop.f32.mrb[4].mxu1 }
 0x123   :  { %v283_v38 = vpop.f32.mrb[5].mxu0  ;;  %v347_v39 = vpop.f32.mrb[5].mxu1 }
 0x124   :  { %v802_v40 = vpop.f32.mrb[6].mxu0  ;;  %v818_v41 = vpop.f32.mrb[6].mxu1 }
 0x125   :  { %v678_v42 = vpack.c.bf16 %v802_v40, %v801_v36  ;;  %v718_v43 = vpack.c.bf16 %v818_v41, %v817_v37  ;;  %v286_v44 = vpop.f32.mrb[7].mxu0  ;;  %v350_v45 = vpop.f32.mrb[7].mxu1 }
 0x126   :  { %v673_v46 = vpack.c.bf16 %v286_v44, %v283_v38  ;;  %v713_v47 = vpack.c.bf16 %v350_v45, %v347_v39 }
 0x127   :  { %742 = vst [vmem:[#allocation7 + $0x18] sm:$0xff] %v678_v42   ;;  %750 = vst [vmem:[#allocation7 + $0x58] sm:$0xff] %v718_v43  }
 0x128   :  { %741 = vst [vmem:[#allocation7 + $0x10] sm:$0xff] %v673_v46   ;;  %749 = vst [vmem:[#allocation7 + $0x50] sm:$0xff] %v713_v47  }
 0x12a   :  { %v805_v48 = vpop.f32.mrb[8].mxu0  ;;  %v821_v49 = vpop.f32.mrb[8].mxu1 }
 0x12b   :  { %v299_v50 = vpop.f32.mrb[9].mxu0  ;;  %v363_v51 = vpop.f32.mrb[9].mxu1 }
 0x12c   :  { %v806_v52 = vpop.f32.mrb[10].mxu0  ;;  %v822_v53 = vpop.f32.mrb[10].mxu1 }
 0x12d   :  { %v688_v54 = vpack.c.bf16 %v806_v52, %v805_v48  ;;  %v728_v55 = vpack.c.bf16 %v822_v53, %v821_v49  ;;  %v302_v56 = vpop.f32.mrb[11].mxu0  ;;  %v366_v57 = vpop.f32.mrb[11].mxu1 }
 0x12e   :  { %v683_v58 = vpack.c.bf16 %v302_v56, %v299_v50  ;;  %v723_v59 = vpack.c.bf16 %v366_v57, %v363_v51 }
 0x12f   :  { %744 = vst [vmem:[#allocation7 + $0x28] sm:$0xff] %v688_v54   ;;  %752 = vst [vmem:[#allocation7 + $0x68] sm:$0xff] %v728_v55  }
 0x130   :  { %743 = vst [vmem:[#allocation7 + $0x20] sm:$0xff] %v683_v58   ;;  %751 = vst [vmem:[#allocation7 + $0x60] sm:$0xff] %v723_v59  }
 0x132   :  { %v809_v60 = vpop.f32.mrb[12].mxu0  ;;  %v825_v61 = vpop.f32.mrb[12].mxu1 }
 0x133   :  { %v315_v62 = vpop.f32.mrb[13].mxu0  ;;  %v379_v63 = vpop.f32.mrb[13].mxu1 }
 0x134   :  { %v810_v0 = vpop.f32.mrb[14].mxu0  ;;  %v826_v1 = vpop.f32.mrb[14].mxu1 }
 0x135   :  { %v698_v2 = vpack.c.bf16 %v810_v0, %v809_v60  ;;  %v738_v3 = vpack.c.bf16 %v826_v1, %v825_v61  ;;  %v318_v4 = vpop.f32.mrb[15].mxu0  ;;  %v382_v5 = vpop.f32.mrb[15].mxu1 }
 0x136   :  { %v693_v6 = vpack.c.bf16 %v318_v4, %v315_v62  ;;  %v733_v7 = vpack.c.bf16 %v382_v5, %v379_v63 }
 0x137   :  { %746 = vst [vmem:[#allocation7 + $0x38] sm:$0xff] %v698_v2   ;;  %754 = vst [vmem:[#allocation7 + $0x78] sm:$0xff] %v738_v3  }
 0x138   :  { %745 = vst [vmem:[#allocation7 + $0x30] sm:$0xff] %v693_v6   ;;  %753 = vst [vmem:[#allocation7 + $0x70] sm:$0xff] %v733_v7  }
 0x139   :  { %927 = shalt.err (!%p924_p6)
}
 0x13a   :  { %s928_s10 = scalar_lea.hbm %s1011_s2, 2048 }
 0x13b   :  { %p929_p7 = scmp.ne.s32.totalorder %s1011_s2, %s928_s10  ;;  %p932_p8 = scmp.lt.u32.totalorder %s928_s10, %s1011_s2 }
 0x13d   :  { %p934_p9 = pnand %p932_p8, %p929_p7 }
 0x13f   :  { %937 = shalt.err (!%p934_p9)
}
 0x140   :  { %565 = dma.vmem_to_hbm [thread:$0]  %s560_s6, 2048, %s1011_s2, [#allocation4], %s945_s19, %s945_s19, %s946_s20  }
 0x141   :  { %942 = dma.done.wait [#allocation4], 2048  }
 0x142   :  { %943 = vsyncadd [#allocation4], 4294965248 }
 0x143   :  { %569 = vsyncpa [#allocation3], 1 }
 0x144   :  { %570 = vsyncpa [#allocation6], 1 }
 0x145   :  { %571 = vsyncpa [#allocation4], 1 }

</bundles_post_ra>
